<compile_context>
chip_gen: v6e
topology: v6e:2x2x1
jax: 0.10.0
libtpu: 0.0.40
codegen_flags: <defaults>
</compile_context>

<pallas_src>
import math
import functools

import numpy as np
import jax
import jax.numpy as jnp
from jax.experimental import pallas as pl
from jax.experimental.pallas import tpu as pltpu


LANES = 128                                # lane-dense output width
_TARGET_IN_BLOCK_BYTES = 4 * 1024 * 1024   # ~4 MiB input block per grid step
_VMEM_LIMIT_BYTES = 32 * 1024 * 1024       # explicit scoped-VMEM budget (safe on v5e/v6e/v7x)


# ----------------------------- small helpers ------------------------------ #

def to_list(x, n):
    if isinstance(x, (list, tuple)):
        assert len(x) == n, (x, n)
        return list(x)
    return [x] * n


def to_pair(x):
    return tuple(to_list(x, 2))


# ------------------------------ Pallas kernels ----------------------------- #

def _max_tap_kernel(x_ref, o_ref, t_ref):
    """x_ref: (T, r_blk, 128) tap stack -> max value + winning tap id."""
    x = x_ref[...]
    best_v = x[0]
    best_t = jnp.zeros(best_v.shape, jnp.int32)
    for t in range(1, x.shape[0]):        # static, unrolled loop over taps
        v = x[t]
        take = v > best_v                 # strict '>' => first tap wins ties
        best_v = jnp.where(take, v, best_v)
        best_t = jnp.where(take, t, best_t)
    o_ref[...] = best_v
    t_ref[...] = best_t


def _max_tap_kernel_noidx(x_ref, o_ref):
    x = x_ref[...]
    best = x[0]
    for t in range(1, x.shape[0]):
        best = jnp.maximum(best, x[t])
    o_ref[...] = best


def _avg_tap_kernel(x_ref, o_ref, *, inv):
    x = x_ref[...]
    acc = x[0].astype(jnp.float32)        # init with first tap (saves one add)
    for t in range(1, x.shape[0]):
        acc = acc + x[t].astype(jnp.float32)
    o_ref[...] = (acc * inv).astype(o_ref.dtype)


# --------------------------- pallas_call wrappers --------------------------- #

def _row_block(rows, taps, itemsize):
    """Rows per grid step: ~4 MiB input blocks, multiple of 8 (or full extent)."""
    r = _TARGET_IN_BLOCK_BYTES // max(1, taps * LANES * itemsize)
    r = max(8, (r // 8) * 8)
    return rows if rows <= r else r


def _pool_tap_stack(taps, pool_type, want_indices):
    """taps: (T, rows, 128). Returns (values, tap_ids_or_None), each (rows, 128)."""
    T, rows, L = taps.shape
    itemsize = jnp.dtype(taps.dtype).itemsize
    r_blk = _row_block(rows, T, itemsize)
    grid = (pl.cdiv(rows, r_blk),)
    in_specs = [pl.BlockSpec((T, r_blk, L), lambda i: (0, i, 0))]
    out_spec = pl.BlockSpec((r_blk, L), lambda i: (i, 0))
    params = pltpu.CompilerParams(
        dimension_semantics=("parallel",),
        vmem_limit_bytes=_VMEM_LIMIT_BYTES,
    )
    in_bytes = T * rows * L * itemsize
    out_bytes_val = rows * L * itemsize

    if pool_type == 'max':
        if want_indices:
            cost = pl.CostEstimate(
                flops=3 * T * rows * L, transcendentals=0,
                bytes_accessed=in_bytes + out_bytes_val + rows * L * 4)
            vals, tap_ids = pl.pallas_call(
                _max_tap_kernel,
                grid=grid,
                in_specs=in_specs,
                out_specs=(out_spec, out_spec),
                out_shape=(jax.ShapeDtypeStruct((rows, L), taps.dtype),
                           jax.ShapeDtypeStruct((rows, L), jnp.int32)),
                compiler_params=params,
                cost_estimate=cost,
            )(taps)
            return vals, tap_ids
        cost = pl.CostEstimate(flops=T * rows * L, transcendentals=0,
                               bytes_accessed=in_bytes + out_bytes_val)
        vals = pl.pallas_call(
            _max_tap_kernel_noidx,
            grid=grid, in_specs=in_specs, out_specs=out_spec,
            out_shape=jax.ShapeDtypeStruct((rows, L), taps.dtype),
            compiler_params=params, cost_estimate=cost,
        )(taps)
        return vals, None

    if pool_type == 'avg':
        cost = pl.CostEstimate(flops=T * rows * L, transcendentals=0,
                               bytes_accessed=in_bytes + out_bytes_val)
        kernel = functools.partial(_avg_tap_kernel, inv=1.0 / float(T))
        vals = pl.pallas_call(
            kernel, grid=grid, in_specs=in_specs, out_specs=out_spec,
            out_shape=jax.ShapeDtypeStruct((rows, L), taps.dtype),
            compiler_params=params, cost_estimate=cost,
        )(taps)
        return vals, None

    raise ValueError(f'{pool_type} pooling unknown.')


# ------------------------------ Pool2d module ------------------------------ #

class Pool2d:
    """JAX/Pallas re-implementation of padertorch Pool2d forward."""

    def __init__(self, pool_type, pool_size, pad_side='both', return_indices=True):
        self.pool_type = pool_type
        self.pool_size = to_pair(pool_size)
        self.pad_side = to_pair(pad_side)
        self.return_indices = return_indices

    def __call__(self, x, seq_len=None):
        ph, pw = self.pool_size
        if ph < 2 and pw < 2:
            return x, seq_len, None

        # --- Pad (constant zeros, like padertorch Pad) ----------------------
        H, W = x.shape[-2], x.shape[-1]
        pad_size = [ph - 1 - (H - 1) % ph, pw - 1 - (W - 1) % pw]
        pad_size = [0 if side is None else s
                    for side, s in zip(self.pad_side, pad_size)]
        if any(s > 0 for s in pad_size):
            widths = [(0, 0), (0, 0)]
            for side, size in zip(self.pad_side, pad_size):
                if side is None or size < 1:
                    widths.append((0, 0))
                elif side == 'front':
                    widths.append((size, 0))
                elif side == 'both':
                    widths.append((size // 2, math.ceil(size / 2)))
                elif side == 'end':
                    widths.append((0, size))
                else:
                    raise ValueError(f'pad side {side} unknown')
            x = jnp.pad(x, widths)

        # --- Trim(side='both') of the remainder -----------------------------
        trims = [x.shape[2] % ph, x.shape[3] % pw]
        slc = [slice(None)] * 4
        for i, size in enumerate(trims):
            if size >= 1:
                slc[2 + i] = slice(size // 2,
                                   x.shape[2 + i] - math.ceil(size / 2))
        x = x[tuple(slc)]

        N, C, Hc, Wc = x.shape
        Ho, Wo = Hc // ph, Wc // pw
        T = ph * pw
        P = N * C * Ho * Wo

        # --- wrapper-side layout plumbing: lane-dense tap stack --------------
        # (N,C,Hc,Wc) -> (NC,Ho,ph,Wo,pw) -> (ph,pw,NC,Ho,Wo) -> (T, P) -> (T, rows, 128)
        taps = x.reshape(N * C, Ho, ph, Wo, pw)
        taps = jnp.transpose(taps, (2, 4, 0, 1, 3)).reshape(T, P)
        P_pad = ((P + LANES - 1) // LANES) * LANES
        if P_pad != P:
            taps = jnp.pad(taps, ((0, 0), (0, P_pad - P)))
        rows = P_pad // LANES
        taps = taps.reshape(T, rows, LANES)

        want_idx = (self.pool_type == 'max') and self.return_indices
        vals, tap_idx = _pool_tap_stack(taps, self.pool_type, want_idx)

        y = vals.reshape(P_pad)[:P].reshape(N, C, Ho, Wo)

        pool_indices = None
        if want_idx:
            # Reconstruct torch-style flat indices h*Wc + w into the
            # padded+trimmed plane from the small winning-tap ids.
            t = tap_idx.reshape(P_pad)[:P].reshape(N, C, Ho, Wo)
            kh = t // pw
            kw = t - kh * pw
            row = (jnp.arange(Ho, dtype=jnp.int32) * ph)[:, None]
            col = (jnp.arange(Wo, dtype=jnp.int32) * pw)[None, :]
            # TODO(synk): torch returns int64 indices; int32 used here.
            pool_indices = (row + kh) * Wc + (col + kw)

        if seq_len is not None:
            seq_len = np.asarray(seq_len) / self.pool_size[-1]
            if self.pad_side[-1] is None:
                seq_len = np.floor(seq_len).astype(int)
            else:
                seq_len = np.ceil(seq_len).astype(int)
        return y, seq_len, pool_indices


# ---------------------------------- main ----------------------------------- #

if __name__ == "__main__":
    key = jax.random.PRNGKey(0)
    x = jax.random.normal(key, (2, 4, 16, 16), jnp.float32)
    seq_len = np.array([16, 12])

    # Max pooling, pool_size=2 (no padding path), with indices.
    y_max, sl_max, idx = Pool2d('max', 2)(x, seq_len)
    jax.block_until_ready(y_max)
    jax.block_until_ready(idx)

    # Avg pooling, pool_size=3 (exercises zero-padding path: 16 -> 18 -> 6).
    y_avg, sl_avg, _ = Pool2d('avg', 3)(x, seq_len)
    jax.block_until_ready(y_avg)

    # Max pooling without indices (fast path).
    y_max2, _, idx2 = Pool2d('max', 2, return_indices=False)(x, seq_len)
    jax.block_until_ready(y_max2)

    # --- reference checks (pure JAX) ---
    ref_max = jnp.max(x.reshape(2, 4, 8, 2, 8, 2), axis=(3, 5))
    assert y_max.shape == (2, 4, 8, 8)
    assert jnp.allclose(y_max, ref_max)
    assert idx2 is None and jnp.allclose(y_max2, ref_max)
    # indices must point at the max values in the (unpadded here) input plane
    gathered = jnp.take_along_axis(
        x.reshape(2, 4, -1), idx.reshape(2, 4, -1), axis=-1
    ).reshape(y_max.shape)
    assert jnp.allclose(gathered, y_max)
    assert list(sl_max) == [8, 6]

    xp = jnp.pad(x, ((0, 0), (0, 0), (1, 1), (1, 1)))
    ref_avg = jnp.mean(xp.reshape(2, 4, 6, 3, 6, 3), axis=(3, 5))
    assert y_avg.shape == (2, 4, 6, 6)
    assert jnp.allclose(y_avg, ref_avg, atol=1e-5)
    assert list(sl_avg) == [6, 4]

    print("KERNEL_OK")
</pallas_src>

<mosaic_0001>
module attributes {stable_mosaic.version = 11 : i64} {
  func.func @_max_tap_kernel(%arg0: i32, %arg1: memref<4x4x128xf32, #tpu.memory_space<vmem>>, %arg2: memref<4x128xf32, #tpu.memory_space<vmem>>, %arg3: memref<4x128xi32, #tpu.memory_space<vmem>>) attributes {dimension_semantics = [#tpu.dimension_semantics<parallel>], iteration_bounds = array<i64: 1>, scalar_prefetch = 0 : i64, scratch_operands = 0 : i64, tpu.core_type = #tpu.core_type<tc>, window_params = [{transform_indices = @transform_0, window_bounds = array<i64: 4, 4, 128>}, {transform_indices = @transform_1, window_bounds = array<i64: 4, 128>}, {transform_indices = @transform_2, window_bounds = array<i64: 4, 128>}]} {
    %c0 = arith.constant 0 : index
    %c0_0 = arith.constant 0 : index
    %c0_1 = arith.constant 0 : index
    %0 = vector.load %arg1[%c0, %c0_0, %c0_1] : memref<4x4x128xf32, #tpu.memory_space<vmem>>, vector<4x4x128xf32>
    %1 = vector.extract_strided_slice %0 {offsets = [0, 0, 0], sizes = [1, 4, 128], strides = [1, 1, 1]} : vector<4x4x128xf32> to vector<1x4x128xf32>
    %2 = vector.shape_cast %1 : vector<1x4x128xf32> to vector<4x128xf32>
    %c0_i32 = arith.constant 0 : i32
    %3 = vector.broadcast %c0_i32 : i32 to vector<4x128xi32>
    %4 = vector.extract_strided_slice %0 {offsets = [1, 0, 0], sizes = [1, 4, 128], strides = [1, 1, 1]} : vector<4x4x128xf32> to vector<1x4x128xf32>
    %5 = vector.shape_cast %4 : vector<1x4x128xf32> to vector<4x128xf32>
    %6 = arith.cmpf ogt, %5, %2 : vector<4x128xf32>
    %7 = arith.select %6, %5, %2 : vector<4x128xi1>, vector<4x128xf32>
    %c1_i32 = arith.constant 1 : i32
    %8 = vector.broadcast %c1_i32 : i32 to vector<4x128xi32>
    %9 = arith.select %6, %8, %3 : vector<4x128xi1>, vector<4x128xi32>
    %10 = vector.extract_strided_slice %0 {offsets = [2, 0, 0], sizes = [1, 4, 128], strides = [1, 1, 1]} : vector<4x4x128xf32> to vector<1x4x128xf32>
    %11 = vector.shape_cast %10 : vector<1x4x128xf32> to vector<4x128xf32>
    %12 = arith.cmpf ogt, %11, %7 : vector<4x128xf32>
    %13 = arith.select %12, %11, %7 : vector<4x128xi1>, vector<4x128xf32>
    %c2_i32 = arith.constant 2 : i32
    %14 = vector.broadcast %c2_i32 : i32 to vector<4x128xi32>
    %15 = arith.select %12, %14, %9 : vector<4x128xi1>, vector<4x128xi32>
    %16 = vector.extract_strided_slice %0 {offsets = [3, 0, 0], sizes = [1, 4, 128], strides = [1, 1, 1]} : vector<4x4x128xf32> to vector<1x4x128xf32>
    %17 = vector.shape_cast %16 : vector<1x4x128xf32> to vector<4x128xf32>
    %18 = arith.cmpf ogt, %17, %13 : vector<4x128xf32>
    %19 = arith.select %18, %17, %13 : vector<4x128xi1>, vector<4x128xf32>
    %c3_i32 = arith.constant 3 : i32
    %20 = vector.broadcast %c3_i32 : i32 to vector<4x128xi32>
    %21 = arith.select %18, %20, %15 : vector<4x128xi1>, vector<4x128xi32>
    %c0_2 = arith.constant 0 : index
    %c0_3 = arith.constant 0 : index
    %22 = vector.load %arg2[%c0_2, %c0_3] : memref<4x128xf32, #tpu.memory_space<vmem>>, vector<4x128xf32>
    tpu.vector_store %arg2[%c0_2, %c0_3], %19 {strides = array<i32>} : memref<4x128xf32, #tpu.memory_space<vmem>>, vector<4x128xf32>,
    %c0_4 = arith.constant 0 : index
    %c0_5 = arith.constant 0 : index
    %23 = vector.load %arg3[%c0_4, %c0_5] : memref<4x128xi32, #tpu.memory_space<vmem>>, vector<4x128xi32>
    tpu.vector_store %arg3[%c0_4, %c0_5], %21 {strides = array<i32>} : memref<4x128xi32, #tpu.memory_space<vmem>>, vector<4x128xi32>,
    return
  }
  func.func @transform_0(%arg0: i32) -> (i32, i32, i32) {
    %c0_i32 = arith.constant 0 : i32
    %c0_i32_0 = arith.constant 0 : i32
    %c0_i32_1 = arith.constant 0 : i32
    return %c0_i32, %arg0, %c0_i32_0 : i32, i32, i32
  }
  func.func @transform_1(%arg0: i32) -> (i32, i32) {
    %c0_i32 = arith.constant 0 : i32
    %c0_i32_0 = arith.constant 0 : i32
    return %arg0, %c0_i32 : i32, i32
  }
  func.func @transform_2(%arg0: i32) -> (i32, i32) {
    %c0_i32 = arith.constant 0 : i32
    %c0_i32_0 = arith.constant 0 : i32
    return %arg0, %c0_i32 : i32, i32
  }
}

</mosaic_0001>

<bundles_post_ra>
// kernel: tpu_custom_call.1
= control target key start
LH: loop header
LB: loop body
LE: loop exit
PB: predicated region body
PF: predicated region fallthrough
CT: control target
= control target key end

     0   :  { %8 = vsyncpa [#allocation3], 0  ;;  %s172_s0 = inlined_call_operand.hbm [shape: f32[4,4,128], index: 0, kind: input, shape index: {}]   ;;  %s173_s1 = inlined_call_operand.hbm [shape: f32[4,128], index: 1, kind: output, shape index: {0}]   ;;  %s174_s2 = inlined_call_operand.hbm [shape: s32[4,128], index: 2, kind: output, shape index: {1}]  }
   0x1   :  { %9 = vsyncpa [#allocation4], 0 }
   0x2   :  { %10 = vsyncpa [#allocation7], 0  ;;  %s142_s9 = smov [#allocation2]  }
   0x3   :  { %s16_s10 = sshll.u32 %s142_s9, 4  ;;  %s17_s10 = int_to_ptr.vmem [resolvable:$true] %s16_s10 }
   0x4   :  { %s84_s11 = scalar_lea.vmem %s17_s10, 256  ;;  %p89_p1 = scmp.lt.s32.totalorder %s17_s10, %s17_s10 }
   0x5   :  { %p85_p0 = scmp.ne.s32.totalorder %s17_s10, %s84_s11  ;;  %p90_p2 = scmp.lt.s32.totalorder %s84_s11, %s84_s11 }
   0x7   :  { %p91_p3 = por %p90_p2, %p89_p1 }
   0x9   :  { %p92_p4 = pnand %p91_p3, %p85_p0 }
   0xb   :  { %95 = shalt.err (!%p92_p4)
}
   0xc   :  { %s143_s12 = smov 64   ;;  %s144_s13 = smov 4  }
   0xd   :  { %22 = dma.hbm_to_vmem [thread:$0]  %s172_s0, 256, %s17_s10, [#allocation3], %s143_s12, %s143_s12, %s144_s13  }
   0xe   :  { %136 = dma.done.wait [#allocation3], 256  }
   0xf   :  { %137 = vsyncadd [#allocation3], 4294967040  ;;  %v26_v0 = vld [vmem:[#allocation2] sm:$0xf]  ;;  %v27_v1 = vld [vmem:[#allocation2 + $0x4] sm:$0xf] }
  0x10   :  { %v28_v2 = vld [vmem:[#allocation2 + $0x8] sm:$0xf]  ;;  %vm30_vm0 = vcmp.gt.f32.partialorder %v27_v1, %v26_v0  ;;  %v29_v3 = vld [vmem:[#allocation2 + $0xc] sm:$0xf]  ;;  %v145_v5 = vmov 0   ;;  %s146_s16 = smov [#allocation5]  }
  0x11   :  { %v31_v4 = vsel %vm30_vm0, %v27_v1, %v26_v0  ;;  %v32_v6 = vsel %vm30_vm0, 1, %v145_v5  ;;  %s47_s17 = sshll.u32 %s146_s16, 4  ;;  %s147_s18 = smov [#allocation6]   ;;  %s48_s17 = int_to_ptr.vmem [resolvable:$true] %s47_s17 }
  0x12   :  { %vm33_vm1 = vcmp.gt.f32.partialorder %v28_v2, %v31_v4  ;;  %s57_s19 = sshll.u32 %s147_s18, 4  ;;  %s96_s0 = scalar_lea.vmem %s48_s17, 64  ;;  %s58_s19 = int_to_ptr.vmem [resolvable:$true] %s57_s19 }
  0x13   :  { %v34_v7 = vsel %vm33_vm1, %v28_v2, %v31_v4  ;;  %v35_v8 = vsel %vm33_vm1, 2, %v32_v6  ;;  %p97_p5 = scmp.ne.s32.totalorder %s48_s17, %s96_s0  ;;  %p101_p6 = scmp.lt.s32.totalorder %s48_s17, %s48_s17 }
  0x14   :  { %vm36_vm2 = vcmp.gt.f32.partialorder %v29_v3, %v34_v7  ;;  %p102_p7 = scmp.lt.s32.totalorder %s96_s0, %s96_s0 }
  0x15   :  { %v37_v9 = vsel %vm36_vm2, %v29_v3, %v34_v7  ;;  %v38_v10 = vsel %vm36_vm2, 3, %v35_v8 }
  0x16   :  { %39 = vst [vmem:[#allocation5] sm:$0xf] %v37_v9  ;;  %40 = vst [vmem:[#allocation6] sm:$0xf] %v38_v10  ;;  %p103_p8 = por %p102_p7, %p101_p6 }
  0x18   :  { %p104_p9 = pnand %p103_p8, %p97_p5 }
  0x1a   :  { %107 = shalt.err (!%p104_p9)
}
  0x1b   :  { %50 = dma.vmem_to_hbm [thread:$0]  %s48_s17, 64, %s173_s1, [#allocation4]  }
  0x1c   :  { %s116_s22 = scalar_lea.vmem %s58_s19, 64  ;;  %p121_p11 = scmp.lt.s32.totalorder %s58_s19, %s58_s19 }
  0x1d   :  { %p117_p10 = scmp.ne.s32.totalorder %s58_s19, %s116_s22  ;;  %p122_p12 = scmp.lt.s32.totalorder %s116_s22, %s116_s22 }
  0x1f   :  { %p123_p13 = por %p122_p12, %p121_p11 }
  0x21   :  { %p124_p0 = pnand %p123_p13, %p117_p10 }
  0x23   :  { %127 = shalt.err (!%p124_p0)
}
  0x24   :  { %60 = dma.vmem_to_hbm [thread:$0]  %s58_s19, 64, %s174_s2, [#allocation7]  }
  0x25   :  { %138 = dma.done.wait [#allocation4], 64  }
  0x26   :  { %139 = vsyncadd [#allocation4], 4294967232 }
  0x27   :  { %140 = dma.done.wait [#allocation7], 64  }
  0x28   :  { %141 = vsyncadd [#allocation7], 4294967232 }
  0x29   :  { %67 = vsyncpa [#allocation3], 1 }
  0x2a   :  { %68 = vsyncpa [#allocation4], 1 }
  0x2b   :  { %69 = vsyncpa [#allocation7], 1 }

</bundles_post_ra>
